<compile_context>
chip_gen: v5e
topology: v5e:2x2
jax: 0.10.0
libtpu: 0.0.40
codegen_flags: <defaults>
</compile_context>

<pallas_src>
import functools

import jax
import jax.numpy as jnp
from jax.experimental import pallas as pl
from jax.experimental.pallas import tpu as pltpu


def _convnext_kernel(x_ref, dww_ref, w2_ref, b2_ref, w3_ref, o_ref, *, H, W):
    # x_ref  : (Bt, C, HW)  batch tile; channels on sublanes, h*W+w on lanes
    # dww_ref: (C, 9)       depthwise 3x3 weights with BN scale folded; tap = kh*3+kw
    # w2_ref : (Ce, C)      1x1 expansion weights (PyTorch OI layout)
    # b2_ref : (Ce, HW)     folded BN bias pushed through conv2, lane-broadcast in wrapper
    # w3_ref : (C, Ce)      1x1 projection weights
    # o_ref  : (Bt, C, HW)
    Bt, C, HW = x_ref.shape

    # --- per-tap masked depthwise weights, hoisted & built at full (C, HW) shape ---
    # (JAX does not CSE broadcast_in_dim; fold the zero-padding border mask into the
    #  weight so each tap is a single pure-VPU FMA operand.)
    lane = jax.lax.broadcasted_iota(jnp.int32, (C, HW), 1)
    col = lane % W
    row_ok = {-1: lane >= W, 1: lane < (H - 1) * W}
    col_ok = {-1: col >= 1, 1: col < (W - 1)}
    taps = []
    for dh in (-1, 0, 1):
        for dw in (-1, 0, 1):
            tap = (dh + 1) * 3 + (dw + 1)
            wcol = dww_ref[:, tap:tap + 1].astype(jnp.float32)        # (C, 1)
            m = row_ok.get(dh)
            cm = col_ok.get(dw)
            if m is None:
                m = cm
            elif cm is not None:
                m = jnp.logical_and(m, cm)
            wfull = (jnp.broadcast_to(wcol, (C, HW)) if m is None
                     else jnp.where(m, wcol, 0.0))                     # (C, HW)
            shift = (-(dh * W + dw)) % HW                # out[s] = x[s + dh*W + dw]
            taps.append((shift, wfull))

    w2 = w2_ref[...].astype(jnp.float32)                 # (Ce, C)
    b2 = b2_ref[...].astype(jnp.float32)                 # (Ce, HW), lane-dense
    w3 = w3_ref[...].astype(jnp.float32)                 # (C, Ce)

    for b in range(Bt):                                  # static, fully unrolled
        x = x_ref[b].astype(jnp.float32)                 # (C, HW)

        # --- depthwise 3x3 (pad=1): XLU lane rolls + VPU FMAs with masked weights ---
        acc = jnp.zeros((C, HW), jnp.float32)
        for shift, wfull in taps:
            t = pltpu.roll(x, shift=shift, axis=1) if shift else x
            acc = acc + t * wfull

        # --- conv2 (1x1, C -> Ce) + folded BN bias + ReLU: MXU matmul ---------------
        h = jnp.maximum(
            jnp.dot(w2, acc, preferred_element_type=jnp.float32) + b2, 0.0)  # (Ce, HW)

        # --- conv3 (1x1, Ce -> C) + residual: MXU matmul ----------------------------
        o = x + jnp.dot(w3, h, preferred_element_type=jnp.float32)           # (C, HW)

        o_ref[b] = o.astype(o_ref.dtype)                 # lane-dense store


def convnext_block_flat(x_flat, dww, w2, bias2, w3, *, H, W,
                        batch_tile=None, core_parallel=False):
    """x_flat: (B, C, H*W). bias2: (Ce,) folded BN bias pushed through conv2.

    batch_tile: elements per grid step (default: whole batch -> single step).
    core_parallel: on v7x, set True (with batch_tile = B // 2) so the batch grid
    axis is split across the two TensorCores via pltpu.CORE_PARALLEL.
    """
    B, C, HW = x_flat.shape
    Ce = w2.shape[0]
    Bt = B if batch_tile is None else batch_tile
    assert B % Bt == 0
    grid = (B // Bt,)

    # Lane-dense (Ce, HW) bias tile: no lane-sparse (Ce,1) block, no in-kernel
    # single-lane -> HW-lane broadcast.
    b2_full = jnp.broadcast_to(bias2.reshape(Ce, 1), (Ce, HW)).astype(jnp.float32)

    dims = (pltpu.CORE_PARALLEL,) if core_parallel else ("parallel",)
    kernel = functools.partial(_convnext_kernel, H=H, W=W)
    return pl.pallas_call(
        kernel,
        out_shape=jax.ShapeDtypeStruct((B, C, HW), x_flat.dtype),
        grid_spec=pltpu.PrefetchScalarGridSpec(
            num_scalar_prefetch=0,
            grid=grid,
            in_specs=[
                pl.BlockSpec((Bt, C, HW), lambda g: (g, 0, 0)),
                pl.BlockSpec((C, 9), lambda g: (0, 0)),
                pl.BlockSpec((Ce, C), lambda g: (0, 0)),
                pl.BlockSpec((Ce, HW), lambda g: (0, 0)),
                pl.BlockSpec((C, Ce), lambda g: (0, 0)),
            ],
            out_specs=pl.BlockSpec((Bt, C, HW), lambda g: (g, 0, 0)),
        ),
        compiler_params=pltpu.CompilerParams(dimension_semantics=dims),
    )(x_flat, dww, w2, b2_full, w3)


def prepare_params(dw_w, gamma, beta, run_mean, run_var, eps, w2, w3):
    """Fold inference BatchNorm into the depthwise weights and a conv2 bias."""
    C = dw_w.shape[0]
    s = gamma / jnp.sqrt(run_var + eps)             # (C,)  BN scale
    b = beta - run_mean * s                         # (C,)  BN bias
    dww = (dw_w * s[:, None, None]).reshape(C, 9)   # (C, 9), tap = kh*3 + kw
    bias2 = w2 @ b                                  # (Ce,) BN bias pushed through conv2
    return dict(dww=dww, w2=w2, bias2=bias2, w3=w3)


def convnext_block_nchw(x_nchw, params, batch_tile=None, core_parallel=False):
    """PyTorch-convention entry point: NCHW in, NCHW out (reshape only)."""
    B, C, H, W = x_nchw.shape
    out = convnext_block_flat(
        x_nchw.reshape(B, C, H * W),
        params["dww"], params["w2"], params["bias2"], params["w3"],
        H=H, W=W, batch_tile=batch_tile, core_parallel=core_parallel)
    return out.reshape(B, C, H, W)


def _reference_nchw(x, dw_w, gamma, beta, run_mean, run_var, eps, w2, w3):
    """Pure-JAX reference (un-folded BN) for a correctness check."""
    B, C, H, W = x.shape
    y = jax.lax.conv_general_dilated(
        x, dw_w.reshape(C, 1, 3, 3),
        window_strides=(1, 1), padding=((1, 1), (1, 1)),
        dimension_numbers=("NCHW", "OIHW", "NCHW"),
        feature_group_count=C,
        precision=jax.lax.Precision.HIGHEST)
    s = gamma / jnp.sqrt(run_var + eps)
    b = beta - run_mean * s
    y = y * s[None, :, None, None] + b[None, :, None, None]
    h = jnp.maximum(jnp.einsum("bchw,ec->behw", y, w2,
                               precision=jax.lax.Precision.HIGHEST), 0.0)
    o = jnp.einsum("behw,ce->bchw", h, w3,
                   precision=jax.lax.Precision.HIGHEST)
    return o + x


if __name__ == "__main__":
    # Module config: ain_bit/aout_bit/w_bit ignored (full precision),
    # C_in = C_out = 8, expansion = 2, kernel_size = 3, stride = 1.
    B, C, H, W = 2, 8, 16, 16
    expansion = 2
    Ce = C * expansion

    key = jax.random.PRNGKey(0)
    kx, kdw, kw2, kw3, kg, kb, km, kv = jax.random.split(key, 8)

    x_nchw = jax.random.normal(kx, (B, C, H, W), jnp.float32)

    # Parameter shapes follow the PyTorch module (bias=False), 1x1 kernels squeezed.
    dw_w = jax.random.normal(kdw, (C, 3, 3), jnp.float32) * 0.1   # conv1 (C,1,3,3)
    w2 = jax.random.normal(kw2, (Ce, C), jnp.float32) * 0.1       # conv2 (Ce,C,1,1)
    w3 = jax.random.normal(kw3, (C, Ce), jnp.float32) * 0.1       # conv3 (C,Ce,1,1)

    # BatchNorm2d(C_out) parameters (inference mode).
    gamma = 1.0 + 0.1 * jax.random.normal(kg, (C,), jnp.float32)
    beta = 0.1 * jax.random.normal(kb, (C,), jnp.float32)
    run_mean = 0.1 * jax.random.normal(km, (C,), jnp.float32)
    run_var = jnp.abs(1.0 + 0.1 * jax.random.normal(kv, (C,), jnp.float32))
    eps = 1e-5

    params = prepare_params(dw_w, gamma, beta, run_mean, run_var, eps, w2, w3)

    fwd = jax.jit(functools.partial(convnext_block_nchw, params=params))
    out = jax.block_until_ready(fwd(x_nchw))
    assert out.shape == (B, C, H, W) and out.dtype == jnp.float32

    ref = _reference_nchw(x_nchw, dw_w, gamma, beta, run_mean, run_var, eps, w2, w3)
    err = float(jnp.max(jnp.abs(out - ref)))
    # Tolerance allows for MXU default-precision 1x1 matmuls (K=8/16, O(1) values);
    # structural bugs would produce errors orders of magnitude larger.
    assert err < 2e-2, f"mismatch vs reference: {err}"

    print("KERNEL_OK")
</pallas_src>

<mosaic_0001>
module attributes {stable_mosaic.version = 11 : i64} {
  func.func @_convnext_kernel(%arg0: i32, %arg1: memref<2x8x256xf32, #tpu.memory_space<vmem>>, %arg2: memref<8x9xf32, #tpu.memory_space<vmem>>, %arg3: memref<16x8xf32, #tpu.memory_space<vmem>>, %arg4: memref<16x256xf32, #tpu.memory_space<vmem>>, %arg5: memref<8x16xf32, #tpu.memory_space<vmem>>, %arg6: memref<2x8x256xf32, #tpu.memory_space<vmem>>) attributes {dimension_semantics = [#tpu.dimension_semantics<parallel>], iteration_bounds = array<i64: 1>, scalar_prefetch = 0 : i64, scratch_operands = 0 : i64, tpu.core_type = #tpu.core_type<tc>, window_params = [{transform_indices = @transform_0, window_bounds = array<i64: 2, 8, 256>}, {pipeline_mode = #tpu.pipeline_mode<synchronous>, transform_indices = @transform_1, window_bounds = array<i64: 8, 9>}, {pipeline_mode = #tpu.pipeline_mode<synchronous>, transform_indices = @transform_2, window_bounds = array<i64: 16, 8>}, {pipeline_mode = #tpu.pipeline_mode<synchronous>, transform_indices = @transform_3, window_bounds = array<i64: 16, 256>}, {pipeline_mode = #tpu.pipeline_mode<synchronous>, transform_indices = @transform_4, window_bounds = array<i64: 8, 16>}, {transform_indices = @transform_5, window_bounds = array<i64: 2, 8, 256>}]} {
    %0 = tpu.iota {dimensions = array<i32: 1>} : vector<8x256xi32>
    %c16_i32 = arith.constant 16 : i32
    %c0_i32 = arith.constant 0 : i32
    %1 = arith.cmpi eq, %c16_i32, %c0_i32 : i32
    %c1_i32 = arith.constant 1 : i32
    %2 = arith.select %1, %c1_i32, %c16_i32 : i32
    %3 = vector.broadcast %2 : i32 to vector<8x256xi32>
    %4 = arith.remsi %0, %3 : vector<8x256xi32>
    %c0_i32_0 = arith.constant 0 : i32
    %5 = vector.broadcast %c0_i32_0 : i32 to vector<8x256xi32>
    %6 = arith.cmpi ne, %4, %5 : vector<8x256xi32>
    %c0_i32_1 = arith.constant 0 : i32
    %7 = vector.broadcast %c0_i32_1 : i32 to vector<8x256xi32>
    %8 = arith.cmpi slt, %4, %7 : vector<8x256xi32>
    %c0_i32_2 = arith.constant 0 : i32
    %9 = arith.cmpi slt, %2, %c0_i32_2 : i32
    %10 = vector.broadcast %9 : i1 to vector<8x256xi1>
    %11 = vector.broadcast %10 : vector<8x256xi1> to vector<8x256xi1>
    %12 = arith.xori %8, %11 : vector<8x256xi1>
    %13 = arith.andi %12, %6 : vector<8x256xi1>
    %14 = vector.broadcast %2 : i32 to vector<8x256xi32>
    %15 = arith.addi %4, %14 : vector<8x256xi32>
    %16 = arith.select %13, %15, %4 : vector<8x256xi1>, vector<8x256xi32>
    %c16_i32_3 = arith.constant 16 : i32
    %17 = vector.broadcast %c16_i32_3 : i32 to vector<8x256xi32>
    %18 = arith.cmpi sge, %0, %17 : vector<8x256xi32>
    %c240_i32 = arith.constant 240 : i32
    %19 = vector.broadcast %c240_i32 : i32 to vector<8x256xi32>
    %20 = arith.cmpi slt, %0, %19 : vector<8x256xi32>
    %c1_i32_4 = arith.constant 1 : i32
    %21 = vector.broadcast %c1_i32_4 : i32 to vector<8x256xi32>
    %22 = arith.cmpi sge, %16, %21 : vector<8x256xi32>
    %c15_i32 = arith.constant 15 : i32
    %23 = vector.broadcast %c15_i32 : i32 to vector<8x256xi32>
    %24 = arith.cmpi slt, %16, %23 : vector<8x256xi32>
    %c0 = arith.constant 0 : index
    %c0_5 = arith.constant 0 : index
    %25 = vector.load %arg2[%c0, %c0_5] : memref<8x9xf32, #tpu.memory_space<vmem>>, vector<8x1xf32>
    %26 = arith.andi %18, %22 : vector<8x256xi1>
    %cst = arith.constant 0.000000e+00 : f32
    %27 = vector.shape_cast %25 : vector<8x1xf32> to vector<8x1xf32>
    %28 = vector.broadcast %27 : vector<8x1xf32> to vector<8x256xf32>
    %29 = vector.broadcast %cst : f32 to vector<8x256xf32>
    %30 = arith.select %26, %28, %29 : vector<8x256xi1>, vector<8x256xf32>
    %c0_6 = arith.constant 0 : index
    %c1 = arith.constant 1 : index
    %31 = vector.load %arg2[%c0_6, %c1] : memref<8x9xf32, #tpu.memory_space<vmem>>, vector<8x1xf32>
    %cst_7 = arith.constant 0.000000e+00 : f32
    %32 = vector.shape_cast %31 : vector<8x1xf32> to vector<8x1xf32>
    %33 = vector.broadcast %32 : vector<8x1xf32> to vector<8x256xf32>
    %34 = vector.broadcast %cst_7 : f32 to vector<8x256xf32>
    %35 = arith.select %18, %33, %34 : vector<8x256xi1>, vector<8x256xf32>
    %c0_8 = arith.constant 0 : index
    %c2 = arith.constant 2 : index
    %36 = vector.load %arg2[%c0_8, %c2] : memref<8x9xf32, #tpu.memory_space<vmem>>, vector<8x1xf32>
    %37 = arith.andi %18, %24 : vector<8x256xi1>
    %cst_9 = arith.constant 0.000000e+00 : f32
    %38 = vector.shape_cast %36 : vector<8x1xf32> to vector<8x1xf32>
    %39 = vector.broadcast %38 : vector<8x1xf32> to vector<8x256xf32>
    %40 = vector.broadcast %cst_9 : f32 to vector<8x256xf32>
    %41 = arith.select %37, %39, %40 : vector<8x256xi1>, vector<8x256xf32>
    %c0_10 = arith.constant 0 : index
    %c3 = arith.constant 3 : index
    %42 = vector.load %arg2[%c0_10, %c3] : memref<8x9xf32, #tpu.memory_space<vmem>>, vector<8x1xf32>
    %cst_11 = arith.constant 0.000000e+00 : f32
    %43 = vector.shape_cast %42 : vector<8x1xf32> to vector<8x1xf32>
    %44 = vector.broadcast %43 : vector<8x1xf32> to vector<8x256xf32>
    %45 = vector.broadcast %cst_11 : f32 to vector<8x256xf32>
    %46 = arith.select %22, %44, %45 : vector<8x256xi1>, vector<8x256xf32>
    %c0_12 = arith.constant 0 : index
    %c4 = arith.constant 4 : index
    %47 = vector.load %arg2[%c0_12, %c4] : memref<8x9xf32, #tpu.memory_space<vmem>>, vector<8x1xf32>
    %48 = vector.shape_cast %47 : vector<8x1xf32> to vector<8x1xf32>
    %49 = vector.broadcast %48 : vector<8x1xf32> to vector<8x256xf32>
    %c0_13 = arith.constant 0 : index
    %c5 = arith.constant 5 : index
    %50 = vector.load %arg2[%c0_13, %c5] : memref<8x9xf32, #tpu.memory_space<vmem>>, vector<8x1xf32>
    %cst_14 = arith.constant 0.000000e+00 : f32
    %51 = vector.shape_cast %50 : vector<8x1xf32> to vector<8x1xf32>
    %52 = vector.broadcast %51 : vector<8x1xf32> to vector<8x256xf32>
    %53 = vector.broadcast %cst_14 : f32 to vector<8x256xf32>
    %54 = arith.select %24, %52, %53 : vector<8x256xi1>, vector<8x256xf32>
    %c0_15 = arith.constant 0 : index
    %c6 = arith.constant 6 : index
    %55 = vector.load %arg2[%c0_15, %c6] : memref<8x9xf32, #tpu.memory_space<vmem>>, vector<8x1xf32>
    %56 = arith.andi %20, %22 : vector<8x256xi1>
    %cst_16 = arith.constant 0.000000e+00 : f32
    %57 = vector.shape_cast %55 : vector<8x1xf32> to vector<8x1xf32>
    %58 = vector.broadcast %57 : vector<8x1xf32> to vector<8x256xf32>
    %59 = vector.broadcast %cst_16 : f32 to vector<8x256xf32>
    %60 = arith.select %56, %58, %59 : vector<8x256xi1>, vector<8x256xf32>
    %c0_17 = arith.constant 0 : index
    %c7 = arith.constant 7 : index
    %61 = vector.load %arg2[%c0_17, %c7] : memref<8x9xf32, #tpu.memory_space<vmem>>, vector<8x1xf32>
    %cst_18 = arith.constant 0.000000e+00 : f32
    %62 = vector.shape_cast %61 : vector<8x1xf32> to vector<8x1xf32>
    %63 = vector.broadcast %62 : vector<8x1xf32> to vector<8x256xf32>
    %64 = vector.broadcast %cst_18 : f32 to vector<8x256xf32>
    %65 = arith.select %20, %63, %64 : vector<8x256xi1>, vector<8x256xf32>
    %c0_19 = arith.constant 0 : index
    %c8 = arith.constant 8 : index
    %66 = vector.load %arg2[%c0_19, %c8] : memref<8x9xf32, #tpu.memory_space<vmem>>, vector<8x1xf32>
    %67 = arith.andi %20, %24 : vector<8x256xi1>
    %cst_20 = arith.constant 0.000000e+00 : f32
    %68 = vector.shape_cast %66 : vector<8x1xf32> to vector<8x1xf32>
    %69 = vector.broadcast %68 : vector<8x1xf32> to vector<8x256xf32>
    %70 = vector.broadcast %cst_20 : f32 to vector<8x256xf32>
    %71 = arith.select %67, %69, %70 : vector<8x256xi1>, vector<8x256xf32>
    %c0_21 = arith.constant 0 : index
    %c0_22 = arith.constant 0 : index
    %72 = vector.load %arg3[%c0_21, %c0_22] : memref<16x8xf32, #tpu.memory_space<vmem>>, vector<16x8xf32>
    %c0_23 = arith.constant 0 : index
    %c0_24 = arith.constant 0 : index
    %73 = vector.load %arg4[%c0_23, %c0_24] : memref<16x256xf32, #tpu.memory_space<vmem>>, vector<16x256xf32>
    %c0_25 = arith.constant 0 : index
    %c0_26 = arith.constant 0 : index
    %74 = vector.load %arg5[%c0_25, %c0_26] : memref<8x16xf32, #tpu.memory_space<vmem>>, vector<8x16xf32>
    %c0_27 = arith.constant 0 : index
    %c0_28 = arith.constant 0 : index
    %c0_29 = arith.constant 0 : index
    %75 = vector.load %arg1[%c0_27, %c0_28, %c0_29] : memref<2x8x256xf32, #tpu.memory_space<vmem>>, vector<1x8x256xf32>
    %76 = vector.shape_cast %75 : vector<1x8x256xf32> to vector<8x256xf32>
    %cst_30 = arith.constant 0.000000e+00 : f32
    %77 = vector.broadcast %cst_30 : f32 to vector<8x256xf32>
    %c17_i32 = arith.constant 17 : i32
    %78 = tpu.dynamic_rotate %76 by %c17_i32 dim 1 : vector<8x256xf32>, i32 -> vector<8x256xf32>
    %79 = arith.mulf %78, %30 : vector<8x256xf32>
    %80 = arith.addf %77, %79 : vector<8x256xf32>
    %c16_i32_31 = arith.constant 16 : i32
    %81 = tpu.dynamic_rotate %76 by %c16_i32_31 dim 1 : vector<8x256xf32>, i32 -> vector<8x256xf32>
    %82 = arith.mulf %81, %35 : vector<8x256xf32>
    %83 = arith.addf %80, %82 : vector<8x256xf32>
    %c15_i32_32 = arith.constant 15 : i32
    %84 = tpu.dynamic_rotate %76 by %c15_i32_32 dim 1 : vector<8x256xf32>, i32 -> vector<8x256xf32>
    %85 = arith.mulf %84, %41 : vector<8x256xf32>
    %86 = arith.addf %83, %85 : vector<8x256xf32>
    %c1_i32_33 = arith.constant 1 : i32
    %87 = tpu.dynamic_rotate %76 by %c1_i32_33 dim 1 : vector<8x256xf32>, i32 -> vector<8x256xf32>
    %88 = arith.mulf %87, %46 : vector<8x256xf32>
    %89 = arith.addf %86, %88 : vector<8x256xf32>
    %90 = arith.mulf %76, %49 : vector<8x256xf32>
    %91 = arith.addf %89, %90 : vector<8x256xf32>
    %c255_i32 = arith.constant 255 : i32
    %92 = tpu.dynamic_rotate %76 by %c255_i32 dim 1 : vector<8x256xf32>, i32 -> vector<8x256xf32>
    %93 = arith.mulf %92, %54 : vector<8x256xf32>
    %94 = arith.addf %91, %93 : vector<8x256xf32>
    %c241_i32 = arith.constant 241 : i32
    %95 = tpu.dynamic_rotate %76 by %c241_i32 dim 1 : vector<8x256xf32>, i32 -> vector<8x256xf32>
    %96 = arith.mulf %95, %60 : vector<8x256xf32>
    %97 = arith.addf %94, %96 : vector<8x256xf32>
    %c240_i32_34 = arith.constant 240 : i32
    %98 = tpu.dynamic_rotate %76 by %c240_i32_34 dim 1 : vector<8x256xf32>, i32 -> vector<8x256xf32>
    %99 = arith.mulf %98, %65 : vector<8x256xf32>
    %100 = arith.addf %97, %99 : vector<8x256xf32>
    %c239_i32 = arith.constant 239 : i32
    %101 = tpu.dynamic_rotate %76 by %c239_i32 dim 1 : vector<8x256xf32>, i32 -> vector<8x256xf32>
    %102 = arith.mulf %101, %71 : vector<8x256xf32>
    %103 = arith.addf %100, %102 : vector<8x256xf32>
    %cst_35 = arith.constant dense<0.000000e+00> : vector<16x256xf32>
    %104 = tpu.matmul %72, %103, %cst_35 {dimension_numbers = #tpu.dot_dimension_numbers<[1], [0], [0], [1], [0, 0, 1, 1], [], []>} : vector<16x8xf32>, vector<8x256xf32>, vector<16x256xf32> -> vector<16x256xf32>
    %105 = arith.addf %104, %73 : vector<16x256xf32>
    %cst_36 = arith.constant 0.000000e+00 : f32
    %106 = vector.broadcast %cst_36 : f32 to vector<16x256xf32>
    %107 = arith.maximumf %105, %106 : vector<16x256xf32>
    %cst_37 = arith.constant dense<0.000000e+00> : vector<8x256xf32>
    %108 = tpu.matmul %74, %107, %cst_37 {dimension_numbers = #tpu.dot_dimension_numbers<[1], [0], [0], [1], [0, 0, 1, 1], [], []>} : vector<8x16xf32>, vector<16x256xf32>, vector<8x256xf32> -> vector<8x256xf32>
    %109 = arith.addf %76, %108 : vector<8x256xf32>
    %c0_38 = arith.constant 0 : index
    %c0_39 = arith.constant 0 : index
    %c0_40 = arith.constant 0 : index
    %110 = vector.load %arg6[%c0_38, %c0_39, %c0_40] : memref<2x8x256xf32, #tpu.memory_space<vmem>>, vector<1x8x256xf32>
    %111 = vector.shape_cast %110 : vector<1x8x256xf32> to vector<8x256xf32>
    %112 = vector.shape_cast %109 : vector<8x256xf32> to vector<1x8x256xf32>
    tpu.vector_store %arg6[%c0_38, %c0_39, %c0_40], %112 {strides = array<i32>} : memref<2x8x256xf32, #tpu.memory_space<vmem>>, vector<1x8x256xf32>,
    %c1_41 = arith.constant 1 : index
    %c0_42 = arith.constant 0 : index
    %c0_43 = arith.constant 0 : index
    %113 = vector.load %arg1[%c1_41, %c0_42, %c0_43] : memref<2x8x256xf32, #tpu.memory_space<vmem>>, vector<1x8x256xf32>
    %114 = vector.shape_cast %113 : vector<1x8x256xf32> to vector<8x256xf32>
    %cst_44 = arith.constant 0.000000e+00 : f32
    %115 = vector.broadcast %cst_44 : f32 to vector<8x256xf32>
    %c17_i32_45 = arith.constant 17 : i32
    %116 = tpu.dynamic_rotate %114 by %c17_i32_45 dim 1 : vector<8x256xf32>, i32 -> vector<8x256xf32>
    %117 = arith.mulf %116, %30 : vector<8x256xf32>
    %118 = arith.addf %115, %117 : vector<8x256xf32>
    %c16_i32_46 = arith.constant 16 : i32
    %119 = tpu.dynamic_rotate %114 by %c16_i32_46 dim 1 : vector<8x256xf32>, i32 -> vector<8x256xf32>
    %120 = arith.mulf %119, %35 : vector<8x256xf32>
    %121 = arith.addf %118, %120 : vector<8x256xf32>
    %c15_i32_47 = arith.constant 15 : i32
    %122 = tpu.dynamic_rotate %114 by %c15_i32_47 dim 1 : vector<8x256xf32>, i32 -> vector<8x256xf32>
    %123 = arith.mulf %122, %41 : vector<8x256xf32>
    %124 = arith.addf %121, %123 : vector<8x256xf32>
    %c1_i32_48 = arith.constant 1 : i32
    %125 = tpu.dynamic_rotate %114 by %c1_i32_48 dim 1 : vector<8x256xf32>, i32 -> vector<8x256xf32>
    %126 = arith.mulf %125, %46 : vector<8x256xf32>
    %127 = arith.addf %124, %126 : vector<8x256xf32>
    %128 = arith.mulf %114, %49 : vector<8x256xf32>
    %129 = arith.addf %127, %128 : vector<8x256xf32>
    %c255_i32_49 = arith.constant 255 : i32
    %130 = tpu.dynamic_rotate %114 by %c255_i32_49 dim 1 : vector<8x256xf32>, i32 -> vector<8x256xf32>
    %131 = arith.mulf %130, %54 : vector<8x256xf32>
    %132 = arith.addf %129, %131 : vector<8x256xf32>
    %c241_i32_50 = arith.constant 241 : i32
    %133 = tpu.dynamic_rotate %114 by %c241_i32_50 dim 1 : vector<8x256xf32>, i32 -> vector<8x256xf32>
    %134 = arith.mulf %133, %60 : vector<8x256xf32>
    %135 = arith.addf %132, %134 : vector<8x256xf32>
    %c240_i32_51 = arith.constant 240 : i32
    %136 = tpu.dynamic_rotate %114 by %c240_i32_51 dim 1 : vector<8x256xf32>, i32 -> vector<8x256xf32>
    %137 = arith.mulf %136, %65 : vector<8x256xf32>
    %138 = arith.addf %135, %137 : vector<8x256xf32>
    %c239_i32_52 = arith.constant 239 : i32
    %139 = tpu.dynamic_rotate %114 by %c239_i32_52 dim 1 : vector<8x256xf32>, i32 -> vector<8x256xf32>
    %140 = arith.mulf %139, %71 : vector<8x256xf32>
    %141 = arith.addf %138, %140 : vector<8x256xf32>
    %cst_53 = arith.constant dense<0.000000e+00> : vector<16x256xf32>
    %142 = tpu.matmul %72, %141, %cst_53 {dimension_numbers = #tpu.dot_dimension_numbers<[1], [0], [0], [1], [0, 0, 1, 1], [], []>} : vector<16x8xf32>, vector<8x256xf32>, vector<16x256xf32> -> vector<16x256xf32>
    %143 = arith.addf %142, %73 : vector<16x256xf32>
    %cst_54 = arith.constant 0.000000e+00 : f32
    %144 = vector.broadcast %cst_54 : f32 to vector<16x256xf32>
    %145 = arith.maximumf %143, %144 : vector<16x256xf32>
    %cst_55 = arith.constant dense<0.000000e+00> : vector<8x256xf32>
    %146 = tpu.matmul %74, %145, %cst_55 {dimension_numbers = #tpu.dot_dimension_numbers<[1], [0], [0], [1], [0, 0, 1, 1], [], []>} : vector<8x16xf32>, vector<16x256xf32>, vector<8x256xf32> -> vector<8x256xf32>
    %147 = arith.addf %114, %146 : vector<8x256xf32>
    %c1_56 = arith.constant 1 : index
    %c0_57 = arith.constant 0 : index
    %c0_58 = arith.constant 0 : index
    %148 = vector.load %arg6[%c1_56, %c0_57, %c0_58] : memref<2x8x256xf32, #tpu.memory_space<vmem>>, vector<1x8x256xf32>
    %149 = vector.shape_cast %148 : vector<1x8x256xf32> to vector<8x256xf32>
    %150 = vector.shape_cast %147 : vector<8x256xf32> to vector<1x8x256xf32>
    tpu.vector_store %arg6[%c1_56, %c0_57, %c0_58], %150 {strides = array<i32>} : memref<2x8x256xf32, #tpu.memory_space<vmem>>, vector<1x8x256xf32>,
    return
  }
  func.func @transform_0(%arg0: i32) -> (i32, i32, i32) {
    %c0_i32 = arith.constant 0 : i32
    %c0_i32_0 = arith.constant 0 : i32
    %c0_i32_1 = arith.constant 0 : i32
    return %arg0, %c0_i32, %c0_i32_0 : i32, i32, i32
  }
  func.func @transform_1(%arg0: i32) -> (i32, i32) {
    %c0_i32 = arith.constant 0 : i32
    %c0_i32_0 = arith.constant 0 : i32
    %c0_i32_1 = arith.constant 0 : i32
    return %c0_i32, %c0_i32_0 : i32, i32
  }
  func.func @transform_2(%arg0: i32) -> (i32, i32) {
    %c0_i32 = arith.constant 0 : i32
    %c0_i32_0 = arith.constant 0 : i32
    %c0_i32_1 = arith.constant 0 : i32
    return %c0_i32, %c0_i32_0 : i32, i32
  }
  func.func @transform_3(%arg0: i32) -> (i32, i32) {
    %c0_i32 = arith.constant 0 : i32
    %c0_i32_0 = arith.constant 0 : i32
    %c0_i32_1 = arith.constant 0 : i32
    return %c0_i32, %c0_i32_0 : i32, i32
  }
  func.func @transform_4(%arg0: i32) -> (i32, i32) {
    %c0_i32 = arith.constant 0 : i32
    %c0_i32_0 = arith.constant 0 : i32
    %c0_i32_1 = arith.constant 0 : i32
    return %c0_i32, %c0_i32_0 : i32, i32
  }
  func.func @transform_5(%arg0: i32) -> (i32, i32, i32) {
    %c0_i32 = arith.constant 0 : i32
    %c0_i32_0 = arith.constant 0 : i32
    %c0_i32_1 = arith.constant 0 : i32
    return %arg0, %c0_i32, %c0_i32_0 : i32, i32, i32
  }
}

</mosaic_0001>

<bundles_post_ra>
// kernel: convnext_block_nchw.1
= control target key start
LH: loop header
LB: loop body
LE: loop exit
PB: predicated region body
PF: predicated region fallthrough
CT: control target
= control target key end

     0   :  { %v552_v0 = vmov 0   ;;  %v553_v3 = vmov 2   ;;  %s554_s22 = smov 17   ;;  %s555_s23 = smov 16   ;;  %v556_v5 = vmov 1   ;;  %v558_v6 = vmov 5   ;;  %s954_s1 = inlined_call_operand.vmem [shape: f32[8,9], index: 1, kind: input, shape index: {}]   ;;  %s955_s0 = inlined_call_operand.vmem [shape: f32[2,8,256], index: 0, kind: input, shape index: {}]   ;;  %s956_s2 = inlined_call_operand.vmem [shape: f32[16,8], index: 2, kind: input, shape index: {}]   ;;  %s957_s3 = inlined_call_operand.vmem [shape: f32[16,256], index: 3, kind: input, shape index: {}]   ;;  %s958_s4 = inlined_call_operand.vmem [shape: f32[8,16], index: 4, kind: input, shape index: {}]   ;;  %s959_s5 = inlined_call_operand.vmem [shape: f32[2,8,256], index: 5, kind: output, shape index: {}]  }
   0x1   :  { %542 = vset.pattern.permute.xlu0 %v552_v0  ;;  %v55_v1 = vld [vmem:[%s954_s1] sm:$0xff]  ;;  %544 = vset.pattern.permute.xlu1 %v553_v3  ;;  %v614_v4 = vld [vmem:[%s955_s0 + $0x8] sm:$0xff]  ;;  %s557_s1 = smov 15   ;;  %v559_v7 = vmov 3   ;;  %s560_s26 = smov 1   ;;  %v562_v8 = vmov 4   ;;  %v20_v28 = vlaneseq }
   0x2   :  { %v605_v2 = vld [vmem:[%s955_s0] sm:$0xff]  ;;  %60 = vperm.xlu0 %542, %v55_v1   ;;  %547 = vset.pattern.permute.xlu2 %v558_v6  ;;  %s561_s27 = smov 127   ;;  %s563_s28 = smov 113   ;;  %v564_v9 = vmov 6   ;;  %v565_v10 = vmov 8   ;;  %v567_v11 = vmov 7  }
   0x3   :  { %126 = vrot.lane.b32.xlu1 %v605_v2, %s554_s22  ;;  %137 = vrot.lane.b32.xlu2 %v605_v2, %s555_s23  ;;  %s566_s29 = smov 112   ;;  %s568_s30 = smov 111   ;;  %v642_v12 = vld [vmem:[%s955_s0 + $0x18] sm:$0xff]  ;;  %v650_v13 = vld [vmem:[%s955_s0 + $0x10] sm:$0xff]  ;;  %v684_v30 = vand.u32 127, %v20_v28 }
   0x5   :  { %v691_v33 = vadd.s32 128, %v684_v30  ;;  %v27_v34 = vand.u32 15, %v684_v30  ;;  %vm47_vm0 = vcmp.ge.s32.totalorder %v684_v30, 16  ;;  %vm141_vm4 = vcmp.lt.s32.totalorder %v684_v30, 16 }
   0x6   :  { %vm130_vm5 = vcmp.lt.s32.totalorder %v684_v30, 17  ;;  %vm152_vm8 = vcmp.lt.s32.totalorder %v684_v30, 15  ;;  %vm163_vm10 = vcmp.lt.s32.totalorder %v684_v30, 1  ;;  %vm178_vm11 = vcmp.lt.s32.totalorder %v684_v30, 127 }
   0x7   :  { %v34_v36 = vand.u32 15, %v691_v33  ;;  %vm696_vm1 = vcmp.ge.s32.totalorder %v27_v34, 1  ;;  %vm700_vm2 = vcmp.lt.s32.totalorder %v27_v34, 15  ;;  %vm50_vm12 = vcmp.lt.s32.totalorder %v691_v33, 240 }
   0x8   :  { %vm56_vm3 = vmand %vm47_vm0, %vm696_vm1  ;;  %vm189_vm13 = vcmp.lt.s32.totalorder %v684_v30, 113  ;;  %vm200_vm15 = vcmp.lt.s32.totalorder %v684_v30, 112 }
   0x9   :  { %vm710_vm6 = vcmp.ge.s32.totalorder %v34_v36, 1  ;;  %vm71_vm7 = vmand %vm47_vm0, %vm700_vm2  ;;  %vm717_vm9 = vcmp.lt.s32.totalorder %v34_v36, 15 }
   0xa   :  { %543 = vset.pattern.permute.xlu0 %v556_v5  ;;  %vm96_vm14 = vmand %vm50_vm12, %vm710_vm6 }
   0xb   :  { %128 = vrot.lane.b32.xlu1 %v614_v4, %s554_s22  ;;  %66 = vperm.xlu0 %543, %v55_v1  }
   0xc   :  { %139 = vrot.lane.b32.xlu2 %v614_v4, %s555_s23 }
  0x13   :  { %74 = vperm.xlu1 %544, %v55_v1   ;;  %150 = vrot.lane.b32.xlu0 %v614_v4, %s557_s1 }
  0x14   :  { %148 = vrot.lane.b32.xlu2 %v605_v2, %s557_s1  ;;  %551 = vset.pattern.permute.xlu0 %v565_v10 }
  0x1b   :  { %545 = vset.pattern.permute.xlu1 %v559_v7  ;;  %161 = vrot.lane.b32.xlu0 %v614_v4, %s560_s26 }
  0x1c   :  { %80 = vperm.xlu1 %545, %v55_v1   ;;  %159 = vrot.lane.b32.xlu2 %v605_v2, %s560_s26 }
  0x23   :  { %174 = vrot.lane.b32.xlu0 %v605_v2, %s561_s27 }
  0x24   :  { %546 = vset.pattern.permute.xlu1 %v562_v8  ;;  %90 = vperm.xlu2 %547, %v55_v1  }
  0x25   :  { %86 = vperm.xlu1 %546, %v55_v1  }
  0x2b   :  { %185 = vrot.lane.b32.xlu0 %v605_v2, %s563_s28 }
  0x2c   :  { %548 = vset.pattern.permute.xlu2 %v564_v9 }
  0x2d   :  { %176 = vrot.lane.b32.xlu1 %v614_v4, %s561_s27  ;;  %98 = vperm.xlu2 %548, %v55_v1  }
  0x33   :  { %196 = vrot.lane.b32.xlu0 %v605_v2, %s566_s29 }
  0x35   :  { %187 = vrot.lane.b32.xlu1 %v614_v4, %s563_s28  ;;  %549 = vset.pattern.permute.xlu2 %v567_v11 }
  0x36   :  { %104 = vperm.xlu2 %549, %v55_v1  }
  0x3b   :  { %207 = vrot.lane.b32.xlu0 %v605_v2, %s568_s30 }
  0x3d   :  { %198 = vrot.lane.b32.xlu1 %v614_v4, %s566_s29 }
  0x3e   :  { %550 = vset.pattern.permute.xlu2 %v565_v10 }
  0x3f   :  { %112 = vperm.xlu2 %550, %v55_v1  }
  0x43   :  { %328 = vrot.lane.b32.xlu0 %v642_v12, %s554_s22 }
  0x45   :  { %209 = vrot.lane.b32.xlu1 %v614_v4, %s568_s30 }
  0x47   :  { %326 = vrot.lane.b32.xlu2 %v650_v13, %s554_s22 }
  0x4b   :  { %346 = vrot.lane.b32.xlu0 %v650_v13, %s557_s1 }
  0x4d   :  { %336 = vrot.lane.b32.xlu1 %v650_v13, %s555_s23 }
  0x4f   :  { %338 = vrot.lane.b32.xlu2 %v642_v12, %s555_s23 }
  0x53   :  { %358 = vrot.lane.b32.xlu0 %v642_v12, %s560_s26 }
  0x55   :  { %348 = vrot.lane.b32.xlu1 %v642_v12, %s557_s1 }
  0x57   :  { %356 = vrot.lane.b32.xlu2 %v650_v13, %s560_s26 }
  0x5b   :  { %380 = vrot.lane.b32.xlu0 %v650_v13, %s563_s28 }
  0x5d   :  { %370 = vrot.lane.b32.xlu1 %v650_v13, %s561_s27  ;;  %v138_v14 = vpop.permute.xlu2 %137 }
  0x5f   :  { %372 = vrot.lane.b32.xlu2 %v642_v12, %s561_s27 }
  0x63   :  { %392 = vrot.lane.b32.xlu0 %v642_v12, %s566_s29 }
  0x65   :  { %382 = vrot.lane.b32.xlu1 %v642_v12, %s563_s28 }
  0x66   :  { %v140_v15 = vpop.permute.xlu2 %139 }
  0x67   :  { %390 = vrot.lane.b32.xlu2 %v650_v13, %s566_s29  ;;  %v142_v44 = vsel %vm141_vm4, %v138_v14, %v140_v15  ;;  %v143_v52 = vsel %vm141_vm4, %v140_v15, %v138_v14 }
  0x6d   :  { %400 = vrot.lane.b32.xlu1 %v650_v13, %s568_s30 }
  0x6e   :  { %v149_v16 = vpop.permute.xlu2 %148 }
  0x6f   :  { %402 = vrot.lane.b32.xlu2 %v642_v12, %s568_s30 }
  0x74   :  { %v61_v18 = vpop.permute.xlu0 %60 }
  0x75   :  { %v127_v17 = vpop.permute.xlu1 %126  ;;  %v721_v43 = vsel %vm56_vm3, %v61_v18, 0.0  ;;  %v732_v47 = vsel %vm710_vm6, %v61_v18, 0.0  ;;  %vm275_vm3 = vcmask 130048  }
  0x76   :  { %v160_v19 = vpop.permute.xlu2 %159 }
  0x7d   :  { %v129_v20 = vpop.permute.xlu1 %128  ;;  %v678_v21 = vpop.permute.xlu0 %66 }
  0x7e   :  { %v680_v22 = vpop.permute.xlu2 %90  ;;  %v132_v45 = vsel %vm130_vm5, %v129_v20, %v127_v17  ;;  %v728_v46 = vsel %vm47_vm0, %v678_v21, 0.0  ;;  %v131_v48 = vsel %vm130_vm5, %v127_v17, %v129_v20  ;;  %v145_v59 = vmul.f32 %v142_v44, %v678_v21  ;;  %vm110_vm0 = vmand %vm50_vm12, %vm717_vm9 }
  0x7f   :  { %v133_v54 = vmul.f32 %v132_v45, %v721_v43  ;;  %v144_v55 = vmul.f32 %v143_v52, %v728_v46  ;;  %v134_v58 = vmul.f32 %v131_v48, %v732_v47  ;;  %v775_v10 = vsel %vm700_vm2, %v680_v22, 0.0 }
  0x80   :  { %v793_v20 = vsel %vm717_vm9, %v680_v22, 0.0 }
  0x81   :  { %v146_v5 = vadd.f32 %v144_v55, %v133_v54  ;;  %v147_v6 = vadd.f32 %v145_v59, %v134_v58 }
  0x85   :  { %v75_v23 = vpop.permute.xlu1 %74  ;;  %v151_v24 = vpop.permute.xlu0 %150 }
  0x86   :  { %v736_v49 = vsel %vm71_vm7, %v75_v23, 0.0  ;;  %v154_v50 = vsel %vm152_vm8, %v151_v24, %v149_v16  ;;  %v747_v56 = vsel %vm717_vm9, %v75_v23, 0.0  ;;  %v153_v57 = vsel %vm152_vm8, %v149_v16, %v151_v24 }
  0x87   :  { %v682_v25 = vpop.permute.xlu2 %98  ;;  %v155_v60 = vmul.f32 %v154_v50, %v736_v49  ;;  %v156_v1 = vmul.f32 %v153_v57, %v747_v56 }
  0x88   :  { %v798_v23 = vsel %vm696_vm1, %v682_v25, 0.0  ;;  %v807_v22 = vsel %vm96_vm14, %v682_v25, 0.0 }
  0x89   :  { %v157_v9 = vadd.f32 %v155_v60, %v146_v5  ;;  %v158_v16 = vadd.f32 %v156_v1, %v147_v6 }
  0x8d   :  { %v162_v26 = vpop.permute.xlu0 %161 }
  0x8e   :  { %v81_v27 = vpop.permute.xlu1 %80  ;;  %v164_v61 = vsel %vm163_vm10, %v160_v19, %v162_v26  ;;  %v165_v62 = vsel %vm163_vm10, %v162_v26, %v160_v19 }
  0x8f   :  { %v760_v63 = vsel %vm696_vm1, %v81_v27, 0.0  ;;  %v764_v0 = vsel %vm710_vm6, %v81_v27, 0.0  ;;  %vm211_vm1 = vcmp.lt.s32.totalorder %v684_v30, 111  ;;  %v121_v30 = vld [vmem:[%s957_s3 + $0x10] sm:$0xff] }
  0x90   :  { %v688_v32 = vpop.permute.xlu2 %104  ;;  %v166_v7 = vmul.f32 %v165_v62, %v760_v63  ;;  %v167_v8 = vmul.f32 %v164_v61, %v764_v0 }
  0x91   :  { %v812_v36 = vsel %vm50_vm12, %v688_v32, 0.0 }
  0x92   :  { %v168_v27 = vadd.f32 %v166_v7, %v157_v9  ;;  %v169_v28 = vadd.f32 %v167_v8, %v158_v16 }
  0x95   :  { %v175_v29 = vpop.permute.xlu0 %174 }
  0x97   :  { %v686_v31 = vpop.permute.xlu1 %86 }
  0x98   :  { %v170_v17 = vmul.f32 %v605_v2, %v686_v31  ;;  %v171_v18 = vmul.f32 %v614_v4, %v686_v31 }
  0x99   :  { %v704_v40 = vpop.permute.xlu2 %112 }
  0x9a   :  { %v173_v41 = vadd.f32 %v171_v18, %v169_v28  ;;  %v833_v54 = vsel %vm110_vm0, %v704_v40, 0.0 }
  0x9d   :  { %v186_v35 = vpop.permute.xlu0 %185 }
  0x9f   :  { %v177_v38 = vpop.permute.xlu1 %176 }
  0xa0   :  { %v179_v11 = vsel %vm178_vm11, %v175_v29, %v177_v38  ;;  %v180_v14 = vsel %vm178_vm11, %v177_v38, %v175_v29  ;;  %v172_v38 = vadd.f32 %v170_v17, %v168_v27 }
  0xa1   :  { %v327_v3 = vpop.permute.xlu2 %326  ;;  %v181_v29 = vmul.f32 %v179_v11, %v775_v10  ;;  %v182_v34 = vmul.f32 %v180_v14, %v793_v20 }
  0xa3   :  { %v183_v25 = vadd.f32 %v181_v29, %v172_v38  ;;  %v184_v48 = vadd.f32 %v182_v34, %v173_v41 }
  0xa5   :  { %v197_v51 = vpop.permute.xlu0 %196 }
  0xa7   :  { %v188_v53 = vpop.permute.xlu1 %187 }
  0xa8   :  { %v190_v24 = vsel %vm189_vm13, %v186_v35, %v188_v53  ;;  %v191_v26 = vsel %vm189_vm13, %v188_v53, %v186_v35  ;;  %v830_v53 = vsel %vm700_vm2, %v704_v40, 0.0  ;;  %vm218_vm2 = vcmask 64512  }
  0xa9   :  { %v192_v44 = vmul.f32 %v190_v24, %v798_v23  ;;  %v193_v45 = vmul.f32 %v191_v26, %v807_v22 }
  0xab   :  { %v194_v58 = vadd.f32 %v192_v44, %v183_v25  ;;  %v195_v59 = vadd.f32 %v193_v45, %v184_v48 }
  0xad   :  { %v208_v15 = vpop.permute.xlu0 %207 }
  0xaf   :  { %v199_v19 = vpop.permute.xlu1 %198 }
  0xb0   :  { %v201_v37 = vsel %vm200_vm15, %v197_v51, %v199_v19  ;;  %v202_v35 = vsel %vm200_vm15, %v199_v19, %v197_v51  ;;  %v339_v51 = vpop.permute.xlu2 %338 }
  0xb1   :  { %v203_v50 = vmul.f32 %v201_v37, %v688_v32  ;;  %v204_v52 = vmul.f32 %v202_v35, %v812_v36 }
  0xb3   :  { %v205_v62 = vadd.f32 %v203_v50, %v194_v58  ;;  %v206_v5 = vadd.f32 %v204_v52, %v195_v59 }
  0xb5   :  { %v329_v42 = vpop.permute.xlu0 %328 }
  0xb6   :  { %v330_v33 = vsel %vm130_vm5, %v327_v3, %v329_v42  ;;  %v331_v55 = vsel %vm130_vm5, %v329_v42, %v327_v3 }
  0xb7   :  { %v210_v57 = vpop.permute.xlu1 %209  ;;  %v332_v60 = vmul.f32 %v331_v55, %v721_v43  ;;  %v333_v61 = vmul.f32 %v330_v33, %v732_v47  ;;  %v850_v43 = vld [vmem:[%s956_s2] sm:$0xff] }
  0xb8   :  { %v212_v39 = vsel %vm211_vm1, %v208_v15, %v210_v57  ;;  %v213_v40 = vsel %vm211_vm1, %v210_v57, %v208_v15  ;;  %v357_v9 = vpop.permute.xlu2 %356  ;;  %v863_v15 = vld [vmem:[%s956_s2 + $0x8] sm:$0xff] }
  0xb9   :  { %v214_v1 = vmul.f32 %v212_v39, %v830_v53  ;;  %v215_v6 = vmul.f32 %v213_v40, %v833_v54 }
  0xbb   :  { %v216_v3 = vadd.f32 %v214_v1, %v205_v62  ;;  %v217_v7 = vadd.f32 %v215_v6, %v206_v5 }
  0xbd   :  { %240 = vmatpush.msra.mxu0 %v216_v3  ;;  %263 = vmatpush.msra.mxu1 %v217_v7  ;;  %v347_v47 = vpop.permute.xlu0 %346 }
  0xbe   :  { %509 = vmatmul.msk.f32.vlgmr.msra.gmra.mxu0 %vm218_vm2, %v850_v43  ;;  %511 = vmatmul.msk.f32.vlgmr.msra.gmra.mxu1 %vm218_vm2, %v850_v43 }
  0xbf   :  { %v337_v8 = vpop.permute.xlu1 %336 }
  0xc0   :  { %v340_v11 = vsel %vm141_vm4, %v337_v8, %v339_v51  ;;  %v341_v14 = vsel %vm141_vm4, %v339_v51, %v337_v8  ;;  %v373_v38 = vpop.permute.xlu2 %372 }
  0xc1   :  { %v342_v16 = vmul.f32 %v341_v14, %v728_v46  ;;  %v343_v17 = vmul.f32 %v340_v11, %v678_v21 }
  0xc3   :  { %v344_v29 = vadd.f32 %v342_v16, %v332_v60  ;;  %v345_v34 = vadd.f32 %v343_v17, %v333_v61  ;;  %v119_v17 = vld [vmem:[%s957_s3] sm:$0xff] }
  0xc5   :  { %v359_v18 = vpop.permute.xlu0 %358 }
  0xc6   :  { %510 = vmatmul.msk.f32.gmra.mxu0 %vm218_vm2, %v863_v15  ;;  %512 = vmatmul.msk.f32.gmra.mxu1 %vm218_vm2, %v863_v15  ;;  %v360_v19 = vsel %vm163_vm10, %v357_v9, %v359_v18  ;;  %v361_v24 = vsel %vm163_vm10, %v359_v18, %v357_v9  ;;  %v120_v18 = vld [vmem:[%s957_s3 + $0x8] sm:$0xff] }
  0xc7   :  { %v349_v26 = vpop.permute.xlu1 %348  ;;  %v362_v27 = vmul.f32 %v361_v24, %v760_v63  ;;  %v363_v46 = vmul.f32 %v360_v19, %v764_v0  ;;  %v366_v63 = vmul.f32 %v650_v13, %v686_v31  ;;  %v367_v0 = vmul.f32 %v642_v12, %v686_v31 }
  0xc8   :  { %v350_v21 = vsel %vm152_vm8, %v347_v47, %v349_v26  ;;  %v351_v28 = vsel %vm152_vm8, %v349_v26, %v347_v47  ;;  %v391_v58 = vpop.permute.xlu2 %390 }
  0xc9   :  { %v352_v37 = vmul.f32 %v351_v28, %v736_v49  ;;  %v353_v35 = vmul.f32 %v350_v21, %v747_v56 }
  0xcb   :  { %v354_v41 = vadd.f32 %v352_v37, %v344_v29  ;;  %v355_v44 = vadd.f32 %v353_v35, %v345_v34  ;;  %v123_v37 = vld [vmem:[%s958_s4] sm:$0xff] }
  0xcd   :  { %v364_v45 = vadd.f32 %v362_v27, %v354_v41  ;;  %v365_v25 = vadd.f32 %v363_v46, %v355_v44  ;;  %v381_v48 = vpop.permute.xlu0 %380 }
  0xcf   :  { %v368_v50 = vadd.f32 %v366_v63, %v364_v45  ;;  %v369_v52 = vadd.f32 %v367_v0, %v365_v25  ;;  %v371_v51 = vpop.permute.xlu1 %370 }
  0xd0   :  { %v374_v49 = vsel %vm178_vm11, %v371_v51, %v373_v38  ;;  %v375_v56 = vsel %vm178_vm11, %v373_v38, %v371_v51  ;;  %v403_v3 = vpop.permute.xlu2 %402 }
  0xd1   :  { %v376_v42 = vmul.f32 %v374_v49, %v775_v10  ;;  %v377_v33 = vmul.f32 %v375_v56, %v793_v20 }
  0xd3   :  { %v378_v55 = vadd.f32 %v376_v42, %v368_v50  ;;  %v379_v57 = vadd.f32 %v377_v33, %v369_v52 }
  0xd5   :  { %v393_v31 = vpop.permute.xlu0 %392 }
  0xd6   :  { %v395_v59 = vsel %vm200_vm15, %v393_v31, %v391_v58  ;;  %v394_v61 = vsel %vm200_vm15, %v391_v58, %v393_v31 }
  0xd7   :  { %v383_v60 = vpop.permute.xlu1 %382  ;;  %v397_v39 = vmul.f32 %v395_v59, %v812_v36  ;;  %v396_v1 = vmul.f32 %v394_v61, %v688_v32 }
  0xd8   :  { %v384_v40 = vsel %vm189_vm13, %v381_v48, %v383_v60  ;;  %v385_v10 = vsel %vm189_vm13, %v383_v60, %v381_v48 }
  0xd9   :  { %v386_v20 = vmul.f32 %v384_v40, %v798_v23  ;;  %v387_v62 = vmul.f32 %v385_v10, %v807_v22 }
  0xdb   :  { %v388_v5 = vadd.f32 %v386_v20, %v378_v55  ;;  %v389_v6 = vadd.f32 %v387_v62, %v379_v57 }
  0xdd   :  { %v398_v7 = vadd.f32 %v396_v1, %v388_v5  ;;  %v399_v47 = vadd.f32 %v397_v39, %v389_v6 }
  0xdf   :  { %v401_v8 = vpop.permute.xlu1 %400 }
  0xe0   :  { %v404_v36 = vsel %vm211_vm1, %v401_v8, %v403_v3  ;;  %v405_v9 = vsel %vm211_vm1, %v403_v3, %v401_v8 }
  0xe1   :  { %v406_v11 = vmul.f32 %v404_v36, %v830_v53  ;;  %v407_v23 = vmul.f32 %v405_v9, %v833_v54  ;;  %v122_v53 = vld [vmem:[%s957_s3 + $0x18] sm:$0xff] }
  0xe3   :  { %v408_v14 = vadd.f32 %v406_v11, %v398_v7  ;;  %v409_v22 = vadd.f32 %v407_v23, %v399_v47 }
 0x13b   :  { %v242_v16 = vpop.f32.mrf.mxu0  ;;  %v265_v32 = vpop.f32.mrf.mxu1 }
 0x13c   :  { %v243_v24 = vadd.f32 %v242_v16, %v119_v17  ;;  %v266_v26 = vadd.f32 %v265_v32, %v120_v18 }
 0x13e   :  { %v271_v29 = vmax.f32 %v243_v24, 0.0  ;;  %v272_v34 = vmax.f32 %v266_v26, 0.0 }
 0x143   :  { %v245_v54 = vpop.f32.mrf.mxu0  ;;  %v268_v19 = vpop.f32.mrf.mxu1 }
 0x144   :  { %v246_v27 = vadd.f32 %v245_v54, %v121_v30  ;;  %v269_v46 = vadd.f32 %v268_v19, %v122_v53 }
 0x146   :  { %v273_v21 = vmax.f32 %v246_v27, 0.0  ;;  %v274_v28 = vmax.f32 %v269_v46, 0.0 }
 0x148   :  { %293 = vmatpush.msra.mxu2 %v273_v21  ;;  %313 = vmatpush.msra.mxu3 %v274_v28 }
 0x14a   :  { %294 = vmatpush.msra.mxu2 %v271_v29  ;;  %314 = vmatpush.msra.mxu3 %v272_v34 }
 0x14b   :  { %513 = vmatmul.msk.f32.vlgmr.msra.gmra.mxu2 %vm275_vm3, %v123_v37  ;;  %514 = vmatmul.msk.f32.vlgmr.msra.gmra.mxu3 %vm275_vm3, %v123_v37 }
 0x14c   :  { %425 = vmatpush.msrb.mxu2 %v408_v14  ;;  %448 = vmatpush.msrb.mxu3 %v409_v22 }
 0x153   :  { %517 = vmatmul.msk.f32.vlgmr.msrb.gmra.mxu2 %vm218_vm2, %v850_v43  ;;  %519 = vmatmul.msk.f32.vlgmr.msrb.gmra.mxu3 %vm218_vm2, %v850_v43 }
 0x15b   :  { %518 = vmatmul.msk.f32.gmra.mxu2 %vm218_vm2, %v863_v15  ;;  %520 = vmatmul.msk.f32.gmra.mxu3 %vm218_vm2, %v863_v15 }
 0x1ce   :  { %v296_v35 = vpop.f32.mrf.mxu2  ;;  %v316_v38 = vpop.f32.mrf.mxu3 }
 0x1cf   :  { %v319_v41 = vadd.f32 %v296_v35, %v605_v2  ;;  %v320_v44 = vadd.f32 %v316_v38, %v614_v4 }
 0x1d1   :  { %321 = vst [vmem:[%s959_s5] sm:$0xff] %v319_v41 }
 0x1d2   :  { %322 = vst [vmem:[%s959_s5 + $0x8] sm:$0xff] %v320_v44 }
 0x1d6   :  { %v427_v43 = vpop.f32.mrf.mxu2  ;;  %v450_v63 = vpop.f32.mrf.mxu3 }
 0x1d7   :  { %v428_v25 = vadd.f32 %v427_v43, %v119_v17  ;;  %v451_v15 = vadd.f32 %v450_v63, %v120_v18 }
 0x1d9   :  { %v456_v51 = vmax.f32 %v428_v25, 0.0  ;;  %v457_v4 = vmax.f32 %v451_v15, 0.0 }
 0x1de   :  { %v430_v0 = vpop.f32.mrf.mxu2  ;;  %v453_v45 = vpop.f32.mrf.mxu3 }
 0x1df   :  { %v431_v48 = vadd.f32 %v430_v0, %v121_v30  ;;  %v454_v50 = vadd.f32 %v453_v45, %v122_v53 }
 0x1e1   :  { %v458_v52 = vmax.f32 %v431_v48, 0.0  ;;  %v459_v2 = vmax.f32 %v454_v50, 0.0 }
 0x1e3   :  { %474 = vmatpush.msrb.mxu0 %v458_v52  ;;  %494 = vmatpush.msrb.mxu1 %v459_v2 }
 0x1e5   :  { %475 = vmatpush.msrb.mxu0 %v456_v51  ;;  %495 = vmatpush.msrb.mxu1 %v457_v4 }
 0x1e6   :  { %521 = vmatmul.msk.f32.vlgmr.msrb.gmra.mxu0 %vm275_vm3, %v123_v37  ;;  %522 = vmatmul.msk.f32.vlgmr.msrb.gmra.mxu1 %vm275_vm3, %v123_v37 }
 0x263   :  { %v477_v49 = vpop.f32.mrf.mxu0  ;;  %v497_v56 = vpop.f32.mrf.mxu1 }
 0x264   :  { %v500_v42 = vadd.f32 %v650_v13, %v477_v49  ;;  %v501_v33 = vadd.f32 %v642_v12, %v497_v56 }
 0x266   :  { %523 = vst [vmem:[%s959_s5 + $0x10] sm:$0xff] %v500_v42 }
 0x267   :  { %524 = vst [vmem:[%s959_s5 + $0x18] sm:$0xff] %v501_v33 }

</bundles_post_ra>
